<compile_context>
chip_gen: v7x
topology: tpu7x:2x2x1
jax: 0.10.0
libtpu: 0.0.40
codegen_flags: <defaults>
</compile_context>

<pallas_src>
import functools

import jax
import jax.numpy as jnp
from jax import lax
from jax.experimental import pallas as pl
from jax.experimental.pallas import tpu as pltpu

NORM_EPS = 1e-5


def _mhca_kernel(xh_ref, ml_ref, mr_ref, w3_ref, bias_ref, wp_ref, o_ref,
                 xs_ref, *, W, TP, PADW):
    # xh_ref:  (1, 1, C, TP + 2*PADW) bf16  pre-haloed pixel window (zeros
    #          outside the image; PADW = W+1 covers the +-(W+1) flattened shift
    #          of the 3x3 taps, so row boundaries need no masking).
    # ml_ref:  (1, 1, TP) bf16   1.0 where the left  (kx=-1) tap stays in-row
    # mr_ref:  (1, 1, TP) bf16   1.0 where the right (kx=+1) tap stays in-row
    # w3_ref:  (C, 9*C) bf16     block-diag grouped-conv weight, BN scale
    #                            folded, K ordered (ky, kx, ci)
    # bias_ref:(C, 1)  f32       folded BN bias
    # wp_ref:  (C, C)  bf16      1x1 projection weight (co, ci)
    # o_ref:   (1, C, TP)        lane-dense output tile
    # xs_ref:  (9*C, TP) bf16    VMEM im2col slab (bounds tap live ranges)
    C = w3_ref.shape[0]
    ml = ml_ref[0]                                     # (1, TP) bf16
    mr = mr_ref[0]                                     # (1, TP) bf16

    # im2col: each of the 9 shifted taps is loaded straight from the haloed
    # VMEM window (static lane slice), masked with one bf16 multiply where
    # needed, and stored to the slab (then dead -> at most one tap live).
    for ky in range(3):
        for kx in range(3):
            off = PADW + (ky - 1) * W + (kx - 1)       # static, in [0, 2*PADW]
            tap = xh_ref[0, 0, :, off:off + TP]        # (C, TP) bf16
            if kx == 0:
                tap = tap * ml                         # kx = -1 row mask
            elif kx == 2:
                tap = tap * mr                         # kx = +1 row mask
            k = ky * 3 + kx
            xs_ref[k * C:(k + 1) * C, :] = tap

    # Fused grouped conv (+ folded BN scale): ONE K = 9*C bf16 matmul, f32 acc.
    acc = jnp.dot(w3_ref[...], xs_ref[...], preferred_element_type=jnp.float32)
    # BN bias + ReLU epilogue (f32, safe on v5e's non-bf16 VPU), cast once.
    y = jnp.maximum(acc + bias_ref[...], 0.0).astype(jnp.bfloat16)
    # 1x1 projection (bf16 operands, f32 accumulation).
    out = jnp.dot(wp_ref[...], y, preferred_element_type=jnp.float32)
    o_ref[...] = out[None].astype(o_ref.dtype)


def mhca_pallas(x_nchw, w_group, bn_gamma, bn_beta, bn_mean, bn_var, w_proj,
                head_dim, out_dtype=jnp.float32):
    """x_nchw: [N, C, H, W] (PyTorch layout).  Returns [N, C, H, W]."""
    N, C, H, W = x_nchw.shape
    G = C // head_dim
    P = H * W
    PADW = W + 1
    out_itemsize = jnp.dtype(out_dtype).itemsize

    # --- VMEM-aware pixel-tile selection (largest lane-dense tile that fits) -
    def step_bytes(tp):
        tpw = tp + 2 * PADW
        in_b = C * tpw * 2 + 2 * tp * 2            # haloed tile + masks (bf16)
        out_b = C * tp * out_itemsize
        xs_b = 9 * C * tp * 2                      # im2col scratch (single buf)
        w_b = (9 * C * C + C * C) * 2 + C * 4      # weights + bias
        return 2 * (in_b + out_b + w_b) + xs_b     # x2: pipeline double-buffer

    VMEM_BUDGET = 24 * 1024 * 1024                 # headroom for v7x's 64 MiB
    TP = None
    for cand in (2048, 1024, 512, 256, 128):       # biggest first (roofline)
        if (P % cand == 0 and N * (P // cand) >= 2
                and step_bytes(cand) <= VMEM_BUDGET):
            TP = cand
            break
    if TP is None:
        TP = P                                     # degenerate tiny/odd shapes
        # TODO(synk): for production shapes where no 128-multiple tile divides
        # H*W (or one image per step blows VMEM), switch to a manually DMA'd
        # halo (memory_space=pl.ANY + make_async_copy) instead.
    T = P // TP
    TPW = TP + 2 * PADW

    # bf16 activations into the kernel: halves input HBM traffic.
    x_flat = x_nchw.reshape(N, C, P).astype(jnp.bfloat16)

    # Pre-haloed pixel windows: xh[n, t] = pixels [t*TP - PADW, (t+1)*TP + PADW)
    # with zeros outside the image, so the kernel does no concatenation and no
    # dynamic slicing.
    x_padp = jnp.pad(x_flat, ((0, 0), (0, 0), (PADW, PADW)))
    xh = jnp.stack([x_padp[:, :, t * TP:t * TP + TPW] for t in range(T)],
                   axis=1)                          # (N, T, C, TPW) bf16

    # Row-boundary masks for the kx = -1 / +1 taps (hoisted out of the kernel;
    # no iota / modulo on the VPU).
    w_idx = (jnp.arange(T * TP, dtype=jnp.int32) % W).reshape(T, 1, TP)
    maskl = (w_idx >= 1).astype(jnp.bfloat16)       # (T, 1, TP)
    maskr = (w_idx <= W - 2).astype(jnp.bfloat16)   # (T, 1, TP)

    # ---- parameter folding (plain JAX, tiny) ----
    # grouped conv weight (C, head_dim, 3, 3) -> dense block-diag (C, C, 3, 3)
    wg = w_group.reshape(G, head_dim, head_dim, 3, 3).astype(jnp.float32)
    w_full = jnp.zeros((C, C, 3, 3), jnp.float32)
    for g in range(G):
        s = slice(g * head_dim, (g + 1) * head_dim)
        w_full = w_full.at[s, s].set(wg[g])
    # TODO(synk): block-diagonal wastes (1 - 1/G) of the conv MXU FLOPs; use a
    # group-packed layout once C grows well beyond ~128.

    # Fold eval-mode BatchNorm: scale into the conv weight, keep only the bias.
    inv_std = lax.rsqrt(bn_var.astype(jnp.float32) + NORM_EPS)
    scale = bn_gamma.astype(jnp.float32) * inv_std
    bias = bn_beta.astype(jnp.float32) - bn_mean.astype(jnp.float32) * scale
    w_scaled = w_full * scale[:, None, None, None]
    # K ordering (ky, kx, ci) matches the slab order built in the kernel.
    w3 = jnp.transpose(w_scaled, (0, 2, 3, 1)).reshape(C, 9 * C).astype(jnp.bfloat16)
    bias2d = bias.reshape(C, 1)
    wp = w_proj.reshape(C, C).astype(jnp.bfloat16)   # (co, ci)

    kernel = functools.partial(_mhca_kernel, W=W, TP=TP, PADW=PADW)
    out_flat = pl.pallas_call(
        kernel,
        out_shape=jax.ShapeDtypeStruct((N, C, P), out_dtype),
        grid_spec=pltpu.PrefetchScalarGridSpec(
            num_scalar_prefetch=0,
            grid=(N, T),
            in_specs=[
                pl.BlockSpec((1, 1, C, TPW), lambda n, t: (n, t, 0, 0)),
                pl.BlockSpec((1, 1, TP), lambda n, t: (t, 0, 0)),
                pl.BlockSpec((1, 1, TP), lambda n, t: (t, 0, 0)),
                pl.BlockSpec((C, 9 * C), lambda n, t: (0, 0)),
                pl.BlockSpec((C, 1), lambda n, t: (0, 0)),
                pl.BlockSpec((C, C), lambda n, t: (0, 0)),
            ],
            out_specs=pl.BlockSpec((1, C, TP), lambda n, t: (n, 0, t)),
            scratch_shapes=[pltpu.VMEM((9 * C, TP), jnp.bfloat16)],
        ),
        compiler_params=pltpu.CompilerParams(
            dimension_semantics=("parallel", "parallel"),
            vmem_limit_bytes=32 * 1024 * 1024),
    )(xh, maskl, maskr, w3, bias2d, wp)

    return out_flat.reshape(N, C, H, W)              # free reshape, stays NCHW


def mhca_reference(x_nchw, w_group, bn_gamma, bn_beta, bn_mean, bn_var, w_proj,
                   head_dim):
    """Pure-JAX reference (matches PyTorch eval-mode forward)."""
    C = x_nchw.shape[1]
    G = C // head_dim
    out = lax.conv_general_dilated(
        x_nchw, w_group, window_strides=(1, 1), padding=((1, 1), (1, 1)),
        dimension_numbers=("NCHW", "OIHW", "NCHW"), feature_group_count=G)
    inv_std = lax.rsqrt(bn_var + NORM_EPS)
    out = (out - bn_mean[None, :, None, None]) * inv_std[None, :, None, None]
    out = out * bn_gamma[None, :, None, None] + bn_beta[None, :, None, None]
    out = jnp.maximum(out, 0.0)
    out = lax.conv_general_dilated(
        out, w_proj, window_strides=(1, 1), padding=((0, 0), (0, 0)),
        dimension_numbers=("NCHW", "OIHW", "NCHW"))
    return out


if __name__ == "__main__":
    # small shapes: batch=2, channels=32, head_dim=8 (-> 4 groups), spatial=16
    N, C, H, W = 2, 32, 16, 16
    head_dim = 8

    key = jax.random.PRNGKey(0)
    k = jax.random.split(key, 7)
    x = jax.random.normal(k[0], (N, C, H, W), jnp.float32)

    # parameters (deterministic init, matching module __init__ shapes)
    w_group = 0.1 * jax.random.normal(k[1], (C, head_dim, 3, 3), jnp.float32)
    w_proj = 0.1 * jax.random.normal(k[2], (C, C, 1, 1), jnp.float32)
    bn_gamma = 1.0 + 0.05 * jax.random.normal(k[3], (C,), jnp.float32)
    bn_beta = 0.05 * jax.random.normal(k[4], (C,), jnp.float32)
    bn_mean = 0.05 * jax.random.normal(k[5], (C,), jnp.float32)
    bn_var = jnp.abs(1.0 + 0.05 * jax.random.normal(k[6], (C,), jnp.float32))
    # NOTE: BatchNorm is applied in eval mode (running stats), the standard
    # inference-time semantics of the module's forward.

    out = mhca_pallas(x, w_group, bn_gamma, bn_beta, bn_mean, bn_var, w_proj,
                      head_dim)
    out = jax.block_until_ready(out)

    ref = mhca_reference(x, w_group, bn_gamma, bn_beta, bn_mean, bn_var,
                         w_proj, head_dim)
    assert out.shape == (N, C, H, W)
    # bf16 MXU operands / bf16 activations (f32 accumulation) -> tolerance is
    # looser than a pure-f32 path.
    rel = jnp.linalg.norm(out - ref) / jnp.linalg.norm(ref)
    assert rel < 3e-2, rel
    assert jnp.allclose(out, ref, atol=5e-2, rtol=5e-2)

    print("KERNEL_OK")
</pallas_src>

<mosaic_0001>
module attributes {stable_mosaic.version = 11 : i64} {
  func.func @_mhca_kernel(%arg0: i32, %arg1: i32, %arg2: memref<1x1x32x290xbf16, #tpu.memory_space<vmem>>, %arg3: memref<1x1x256xbf16, #tpu.memory_space<vmem>>, %arg4: memref<1x1x256xbf16, #tpu.memory_space<vmem>>, %arg5: memref<32x288xbf16, #tpu.memory_space<vmem>>, %arg6: memref<32x1xf32, #tpu.memory_space<vmem>>, %arg7: memref<32x32xbf16, #tpu.memory_space<vmem>>, %arg8: memref<1x32x256xf32, #tpu.memory_space<vmem>>, %arg9: memref<288x256xbf16, #tpu.memory_space<vmem>>) attributes {dimension_semantics = [#tpu.dimension_semantics<parallel>, #tpu.dimension_semantics<parallel>], iteration_bounds = array<i64: 2, 1>, scalar_prefetch = 0 : i64, scratch_operands = 1 : i64, tpu.core_type = #tpu.core_type<tc>, window_params = [{transform_indices = @transform_0, window_bounds = array<i64: 1, 1, 32, 290>}, {transform_indices = @transform_1, window_bounds = array<i64: 1, 1, 256>}, {transform_indices = @transform_2, window_bounds = array<i64: 1, 1, 256>}, {pipeline_mode = #tpu.pipeline_mode<synchronous>, transform_indices = @transform_3, window_bounds = array<i64: 32, 288>}, {pipeline_mode = #tpu.pipeline_mode<synchronous>, transform_indices = @transform_4, window_bounds = array<i64: 32, 1>}, {pipeline_mode = #tpu.pipeline_mode<synchronous>, transform_indices = @transform_5, window_bounds = array<i64: 32, 32>}, {transform_indices = @transform_6, window_bounds = array<i64: 1, 32, 256>}]} {
    %c0 = arith.constant 0 : index
    %c0_0 = arith.constant 0 : index
    %c0_1 = arith.constant 0 : index
    %0 = vector.load %arg3[%c0, %c0_0, %c0_1] : memref<1x1x256xbf16, #tpu.memory_space<vmem>>, vector<1x1x256xbf16>
    %1 = vector.shape_cast %0 : vector<1x1x256xbf16> to vector<1x256xbf16>
    %c0_2 = arith.constant 0 : index
    %c0_3 = arith.constant 0 : index
    %c0_4 = arith.constant 0 : index
    %2 = vector.load %arg4[%c0_2, %c0_3, %c0_4] : memref<1x1x256xbf16, #tpu.memory_space<vmem>>, vector<1x1x256xbf16>
    %3 = vector.shape_cast %2 : vector<1x1x256xbf16> to vector<1x256xbf16>
    %c0_5 = arith.constant 0 : index
    %c0_6 = arith.constant 0 : index
    %c0_7 = arith.constant 0 : index
    %c0_8 = arith.constant 0 : index
    %4 = vector.load %arg2[%c0_5, %c0_6, %c0_7, %c0_8] : memref<1x1x32x290xbf16, #tpu.memory_space<vmem>>, vector<1x1x32x256xbf16>
    %5 = vector.shape_cast %4 : vector<1x1x32x256xbf16> to vector<32x256xbf16>
    %6 = vector.broadcast %1 : vector<1x256xbf16> to vector<32x256xbf16>
    %7 = arith.mulf %5, %6 : vector<32x256xbf16>
    %c0_9 = arith.constant 0 : index
    %c0_10 = arith.constant 0 : index
    %8 = vector.load %arg9[%c0_9, %c0_10] : memref<288x256xbf16, #tpu.memory_space<vmem>>, vector<32x256xbf16>
    tpu.vector_store %arg9[%c0_9, %c0_10], %7 {strides = array<i32>} : memref<288x256xbf16, #tpu.memory_space<vmem>>, vector<32x256xbf16>,
    %c0_11 = arith.constant 0 : index
    %c0_12 = arith.constant 0 : index
    %c0_13 = arith.constant 0 : index
    %c1 = arith.constant 1 : index
    %9 = vector.load %arg2[%c0_11, %c0_12, %c0_13, %c1] : memref<1x1x32x290xbf16, #tpu.memory_space<vmem>>, vector<1x1x32x256xbf16>
    %10 = vector.shape_cast %9 : vector<1x1x32x256xbf16> to vector<32x256xbf16>
    %c32 = arith.constant 32 : index
    %c0_14 = arith.constant 0 : index
    %11 = vector.load %arg9[%c32, %c0_14] : memref<288x256xbf16, #tpu.memory_space<vmem>>, vector<32x256xbf16>
    tpu.vector_store %arg9[%c32, %c0_14], %10 {strides = array<i32>} : memref<288x256xbf16, #tpu.memory_space<vmem>>, vector<32x256xbf16>,
    %c0_15 = arith.constant 0 : index
    %c0_16 = arith.constant 0 : index
    %c0_17 = arith.constant 0 : index
    %c2 = arith.constant 2 : index
    %12 = vector.load %arg2[%c0_15, %c0_16, %c0_17, %c2] : memref<1x1x32x290xbf16, #tpu.memory_space<vmem>>, vector<1x1x32x256xbf16>
    %13 = vector.shape_cast %12 : vector<1x1x32x256xbf16> to vector<32x256xbf16>
    %14 = vector.broadcast %3 : vector<1x256xbf16> to vector<32x256xbf16>
    %15 = arith.mulf %13, %14 : vector<32x256xbf16>
    %c64 = arith.constant 64 : index
    %c0_18 = arith.constant 0 : index
    %16 = vector.load %arg9[%c64, %c0_18] : memref<288x256xbf16, #tpu.memory_space<vmem>>, vector<32x256xbf16>
    tpu.vector_store %arg9[%c64, %c0_18], %15 {strides = array<i32>} : memref<288x256xbf16, #tpu.memory_space<vmem>>, vector<32x256xbf16>,
    %c0_19 = arith.constant 0 : index
    %c0_20 = arith.constant 0 : index
    %c0_21 = arith.constant 0 : index
    %c16 = arith.constant 16 : index
    %17 = vector.load %arg2[%c0_19, %c0_20, %c0_21, %c16] : memref<1x1x32x290xbf16, #tpu.memory_space<vmem>>, vector<1x1x32x256xbf16>
    %18 = vector.shape_cast %17 : vector<1x1x32x256xbf16> to vector<32x256xbf16>
    %19 = vector.broadcast %1 : vector<1x256xbf16> to vector<32x256xbf16>
    %20 = arith.mulf %18, %19 : vector<32x256xbf16>
    %c96 = arith.constant 96 : index
    %c0_22 = arith.constant 0 : index
    %21 = vector.load %arg9[%c96, %c0_22] : memref<288x256xbf16, #tpu.memory_space<vmem>>, vector<32x256xbf16>
    tpu.vector_store %arg9[%c96, %c0_22], %20 {strides = array<i32>} : memref<288x256xbf16, #tpu.memory_space<vmem>>, vector<32x256xbf16>,
    %c0_23 = arith.constant 0 : index
    %c0_24 = arith.constant 0 : index
    %c0_25 = arith.constant 0 : index
    %c17 = arith.constant 17 : index
    %22 = vector.load %arg2[%c0_23, %c0_24, %c0_25, %c17] : memref<1x1x32x290xbf16, #tpu.memory_space<vmem>>, vector<1x1x32x256xbf16>
    %23 = vector.shape_cast %22 : vector<1x1x32x256xbf16> to vector<32x256xbf16>
    %c128 = arith.constant 128 : index
    %c0_26 = arith.constant 0 : index
    %24 = vector.load %arg9[%c128, %c0_26] : memref<288x256xbf16, #tpu.memory_space<vmem>>, vector<32x256xbf16>
    tpu.vector_store %arg9[%c128, %c0_26], %23 {strides = array<i32>} : memref<288x256xbf16, #tpu.memory_space<vmem>>, vector<32x256xbf16>,
    %c0_27 = arith.constant 0 : index
    %c0_28 = arith.constant 0 : index
    %c0_29 = arith.constant 0 : index
    %c18 = arith.constant 18 : index
    %25 = vector.load %arg2[%c0_27, %c0_28, %c0_29, %c18] : memref<1x1x32x290xbf16, #tpu.memory_space<vmem>>, vector<1x1x32x256xbf16>
    %26 = vector.shape_cast %25 : vector<1x1x32x256xbf16> to vector<32x256xbf16>
    %27 = vector.broadcast %3 : vector<1x256xbf16> to vector<32x256xbf16>
    %28 = arith.mulf %26, %27 : vector<32x256xbf16>
    %c160 = arith.constant 160 : index
    %c0_30 = arith.constant 0 : index
    %29 = vector.load %arg9[%c160, %c0_30] : memref<288x256xbf16, #tpu.memory_space<vmem>>, vector<32x256xbf16>
    tpu.vector_store %arg9[%c160, %c0_30], %28 {strides = array<i32>} : memref<288x256xbf16, #tpu.memory_space<vmem>>, vector<32x256xbf16>,
    %c0_31 = arith.constant 0 : index
    %c0_32 = arith.constant 0 : index
    %c0_33 = arith.constant 0 : index
    %c32_34 = arith.constant 32 : index
    %30 = vector.load %arg2[%c0_31, %c0_32, %c0_33, %c32_34] : memref<1x1x32x290xbf16, #tpu.memory_space<vmem>>, vector<1x1x32x256xbf16>
    %31 = vector.shape_cast %30 : vector<1x1x32x256xbf16> to vector<32x256xbf16>
    %32 = vector.broadcast %1 : vector<1x256xbf16> to vector<32x256xbf16>
    %33 = arith.mulf %31, %32 : vector<32x256xbf16>
    %c192 = arith.constant 192 : index
    %c0_35 = arith.constant 0 : index
    %34 = vector.load %arg9[%c192, %c0_35] : memref<288x256xbf16, #tpu.memory_space<vmem>>, vector<32x256xbf16>
    tpu.vector_store %arg9[%c192, %c0_35], %33 {strides = array<i32>} : memref<288x256xbf16, #tpu.memory_space<vmem>>, vector<32x256xbf16>,
    %c0_36 = arith.constant 0 : index
    %c0_37 = arith.constant 0 : index
    %c0_38 = arith.constant 0 : index
    %c33 = arith.constant 33 : index
    %35 = vector.load %arg2[%c0_36, %c0_37, %c0_38, %c33] : memref<1x1x32x290xbf16, #tpu.memory_space<vmem>>, vector<1x1x32x256xbf16>
    %36 = vector.shape_cast %35 : vector<1x1x32x256xbf16> to vector<32x256xbf16>
    %c224 = arith.constant 224 : index
    %c0_39 = arith.constant 0 : index
    %37 = vector.load %arg9[%c224, %c0_39] : memref<288x256xbf16, #tpu.memory_space<vmem>>, vector<32x256xbf16>
    tpu.vector_store %arg9[%c224, %c0_39], %36 {strides = array<i32>} : memref<288x256xbf16, #tpu.memory_space<vmem>>, vector<32x256xbf16>,
    %c0_40 = arith.constant 0 : index
    %c0_41 = arith.constant 0 : index
    %c0_42 = arith.constant 0 : index
    %c34 = arith.constant 34 : index
    %38 = vector.load %arg2[%c0_40, %c0_41, %c0_42, %c34] : memref<1x1x32x290xbf16, #tpu.memory_space<vmem>>, vector<1x1x32x256xbf16>
    %39 = vector.shape_cast %38 : vector<1x1x32x256xbf16> to vector<32x256xbf16>
    %40 = vector.broadcast %3 : vector<1x256xbf16> to vector<32x256xbf16>
    %41 = arith.mulf %39, %40 : vector<32x256xbf16>
    %c256 = arith.constant 256 : index
    %c0_43 = arith.constant 0 : index
    %42 = vector.load %arg9[%c256, %c0_43] : memref<288x256xbf16, #tpu.memory_space<vmem>>, vector<32x256xbf16>
    tpu.vector_store %arg9[%c256, %c0_43], %41 {strides = array<i32>} : memref<288x256xbf16, #tpu.memory_space<vmem>>, vector<32x256xbf16>,
    %c0_44 = arith.constant 0 : index
    %c0_45 = arith.constant 0 : index
    %43 = vector.load %arg5[%c0_44, %c0_45] : memref<32x288xbf16, #tpu.memory_space<vmem>>, vector<32x288xbf16>
    %c0_46 = arith.constant 0 : index
    %c0_47 = arith.constant 0 : index
    %44 = vector.load %arg9[%c0_46, %c0_47] : memref<288x256xbf16, #tpu.memory_space<vmem>>, vector<288x256xbf16>
    %cst = arith.constant dense<0.000000e+00> : vector<32x256xf32>
    %45 = tpu.matmul %43, %44, %cst {dimension_numbers = #tpu.dot_dimension_numbers<[1], [0], [0], [1], [0, 0, 1, 1], [], []>} : vector<32x288xbf16>, vector<288x256xbf16>, vector<32x256xf32> -> vector<32x256xf32>
    %c0_48 = arith.constant 0 : index
    %c0_49 = arith.constant 0 : index
    %46 = vector.load %arg6[%c0_48, %c0_49] : memref<32x1xf32, #tpu.memory_space<vmem>>, vector<32x1xf32>
    %47 = vector.broadcast %46 : vector<32x1xf32> to vector<32x256xf32>
    %48 = arith.addf %45, %47 : vector<32x256xf32>
    %cst_50 = arith.constant 0.000000e+00 : f32
    %49 = vector.broadcast %cst_50 : f32 to vector<32x256xf32>
    %50 = arith.maximumf %48, %49 : vector<32x256xf32>
    %51 = arith.truncf %50 : vector<32x256xf32> to vector<32x256xbf16>
    %c0_51 = arith.constant 0 : index
    %c0_52 = arith.constant 0 : index
    %52 = vector.load %arg7[%c0_51, %c0_52] : memref<32x32xbf16, #tpu.memory_space<vmem>>, vector<32x32xbf16>
    %cst_53 = arith.constant dense<0.000000e+00> : vector<32x256xf32>
    %53 = tpu.matmul %52, %51, %cst_53 {dimension_numbers = #tpu.dot_dimension_numbers<[1], [0], [0], [1], [0, 0, 1, 1], [], []>} : vector<32x32xbf16>, vector<32x256xbf16>, vector<32x256xf32> -> vector<32x256xf32>
    %54 = vector.shape_cast %53 : vector<32x256xf32> to vector<1x32x256xf32>
    %c0_54 = arith.constant 0 : index
    %c0_55 = arith.constant 0 : index
    %c0_56 = arith.constant 0 : index
    %55 = vector.load %arg8[%c0_54, %c0_55, %c0_56] : memref<1x32x256xf32, #tpu.memory_space<vmem>>, vector<1x32x256xf32>
    tpu.vector_store %arg8[%c0_54, %c0_55, %c0_56], %54 {strides = array<i32>} : memref<1x32x256xf32, #tpu.memory_space<vmem>>, vector<1x32x256xf32>,
    return
  }
  func.func @transform_0(%arg0: i32, %arg1: i32) -> (i32, i32, i32, i32) {
    %c0_i32 = arith.constant 0 : i32
    %c0_i32_0 = arith.constant 0 : i32
    %c0_i32_1 = arith.constant 0 : i32
    return %arg0, %arg1, %c0_i32, %c0_i32_0 : i32, i32, i32, i32
  }
  func.func @transform_1(%arg0: i32, %arg1: i32) -> (i32, i32, i32) {
    %c0_i32 = arith.constant 0 : i32
    %c0_i32_0 = arith.constant 0 : i32
    %c0_i32_1 = arith.constant 0 : i32
    return %arg1, %c0_i32, %c0_i32_0 : i32, i32, i32
  }
  func.func @transform_2(%arg0: i32, %arg1: i32) -> (i32, i32, i32) {
    %c0_i32 = arith.constant 0 : i32
    %c0_i32_0 = arith.constant 0 : i32
    %c0_i32_1 = arith.constant 0 : i32
    return %arg1, %c0_i32, %c0_i32_0 : i32, i32, i32
  }
  func.func @transform_3(%arg0: i32, %arg1: i32) -> (i32, i32) {
    %c0_i32 = arith.constant 0 : i32
    %c0_i32_0 = arith.constant 0 : i32
    %c0_i32_1 = arith.constant 0 : i32
    return %c0_i32, %c0_i32_0 : i32, i32
  }
  func.func @transform_4(%arg0: i32, %arg1: i32) -> (i32, i32) {
    %c0_i32 = arith.constant 0 : i32
    %c0_i32_0 = arith.constant 0 : i32
    %c0_i32_1 = arith.constant 0 : i32
    return %c0_i32, %c0_i32_0 : i32, i32
  }
  func.func @transform_5(%arg0: i32, %arg1: i32) -> (i32, i32) {
    %c0_i32 = arith.constant 0 : i32
    %c0_i32_0 = arith.constant 0 : i32
    %c0_i32_1 = arith.constant 0 : i32
    return %c0_i32, %c0_i32_0 : i32, i32
  }
  func.func @transform_6(%arg0: i32, %arg1: i32) -> (i32, i32, i32) {
    %c0_i32 = arith.constant 0 : i32
    %c0_i32_0 = arith.constant 0 : i32
    return %arg0, %c0_i32, %arg1 : i32, i32, i32
  }
}

</mosaic_0001>

<bundles_post_ra>
// kernel: tpu_custom_call.1
= control target key start
LH: loop header
LB: loop body
LE: loop exit
PB: predicated region body
PF: predicated region fallthrough
CT: control target
= control target key end

     0   :  { %11 = vsyncpa [#allocation4], 0  ;;  %s2329_s0 = inlined_call_operand.hbm [shape: bf16[2,1,32,290], index: 0, kind: input, shape index: {}]   ;;  %s2330_s1 = inlined_call_operand.vmem [shape: bf16[1,1,256], index: 1, kind: input, shape index: {}]   ;;  %s2331_s2 = inlined_call_operand.vmem [shape: bf16[1,1,256], index: 2, kind: input, shape index: {}]   ;;  %s2332_s3 = inlined_call_operand.hbm [shape: bf16[32,288], index: 3, kind: input, shape index: {}]   ;;  %s2333_s4 = inlined_call_operand.vmem [shape: f32[32,1], index: 4, kind: input, shape index: {}]   ;;  %s2334_s5 = inlined_call_operand.vmem [shape: bf16[32,32], index: 5, kind: input, shape index: {}]   ;;  %s2335_s6 = inlined_call_operand.hbm [shape: f32[2,32,256], index: 6, kind: output, shape index: {}]  }
   0x1   :  { %13 = vsyncpa [#allocation4 + $0x1], 0 }
   0x2   :  { %14 = vsyncpa [#allocation7], 0 }
   0x3   :  { %15 = vsyncpa [#allocation5], 0 }
   0x4   :  { %17 = vsyncpa [#allocation5 + $0x1], 0  ;;  %s1871_s21 = smov 0   ;;  %s1873_s22 = smov 0  }
   0x5   :  { %s1875_s23 = smov 0   ;;  %s1877_s24 = smov 0  }
   0x6   :  { %s1879_s25 = smov 0   ;;  %s1881_s26 = smov 0  }
   0x7 LB: > { %s1452_s27 = sadd.s32 4294967295, %s1813_s26   ;;  %s1453_s28 = sadd.s32 4294967294, %s1813_s26   ;;  %s1813_s26 = sphi %s1881_s26, %s23_s26   ;;  %s1809_s25 = sphi %s1879_s25, %s2362_s25   ;;  %s1805_s24 = sphi %s1877_s24, %s2361_s24   ;;  %s1801_s23 = sphi %s1875_s23, %s2360_s23   ;;  %s1797_s22 = sphi %s1873_s22, %s2359_s22   ;;  %s1793_s21 = sphi %s1871_s21, %s2358_s21  }
   0x8   : > { %p57_p0 = scmp.ne.s32.totalorder %s1797_s22, %s1793_s21  ;;  %p1905_p1 = scmp.eq.s32.totalorder %s1452_s27, 0 }
   0x9   : > { %p1909_p2 = scmp.eq.s32.totalorder %s1452_s27, 1  ;;  %p204_p3 = scmp.eq.s32.totalorder %s1453_s28, 1 }
   0xa   : > { %s2342_s29 = scalar_select %p1905_p1, 1, 0 }
   0xb   : > { %s2343_s30 = scalar_select %p1909_p2, 1, 0 }
   0xc   : > { %p1915_p4 = por %p1905_p1, %p57_p0  ;;  %p1454_p5 = scmp.ge.s32.totalorder %s1813_s26, 1 }
   0xd   : > { %p1920_p6 = por %p204_p3, %p57_p0  ;;  %p211_p7 = scmp.lt.s32.totalorder %s1813_s26, 3 }
   0xe   : > { %s2344_s7 = scalar_select %p1915_p4, 1, 0 }
   0xf   : > { %s2345_s8 = scalar_select %p1920_p6, 1, 0 }
  0x10   : > { %p1925_p8 = pnand %p1454_p5, %p211_p7  ;;  %s1815_s10 = smov [#allocation6]  }
  0x11   : > { %s237_s11 = sshll.u32 %s1815_s10, 4  ;;  %s35_s13 = sadd.s32 1, %s1809_s25  ;;  %s238_s11 = int_to_ptr.vmem [resolvable:$true] %s237_s11 }
  0x12   : > { %s2346_s9 = scalar_select %p1925_p8, 1, 0 }
  0x13   : > { %p1564_p9 = pneg %p1925_p8  ;;  %s1669_s16 = scalar_lea.hbm %s2332_s3, 768 }
  0x14   : > { %p1670_p12 = scmp.ne.s32.totalorder %s2332_s3, %s1669_s16  ;;  %p1676_p5 = scmp.lt.u32.totalorder %s1669_s16, %s2332_s3 }
  0x15   : > { %p1934_p11 = pnand %p1564_p9, %p1905_p1 }
  0x17   : > { %p1671_p13 = pneg %p1934_p11 }
  0x19   : > { %p1672_p0 = pnand %p1671_p13, %p1670_p12 }
  0x1b   : > { %p1673_p3 = pneg %p1672_p0 }
  0x1d   : > { %p1678_p7 = pnand %p1676_p5, %p1673_p3 }
  0x1f   : > { %1681 = shalt.err (!%p1678_p7)
}
  0x20   : > { %s1682_s27 = scalar_lea.vmem %s238_s11, 768  ;;  %p1690_p1 = scmp.lt.s32.totalorder %s238_s11, %s238_s11 }
  0x21   : > { %p1683_p9 = scmp.ne.s32.totalorder %s238_s11, %s1682_s27  ;;  %p1691_p4 = scmp.lt.s32.totalorder %s1682_s27, %s1682_s27 }
  0x23   : > { %p1685_p10 = pnand %p1683_p9, %p1671_p13  ;;  %p1692_p8 = por %p1691_p4, %p1690_p1 }
  0x25   : > { %p1686_p6 = pneg %p1685_p10 }
  0x27   : > { %p1693_p2 = pnand %p1692_p8, %p1686_p6 }
  0x29   : > { %1696 = shalt.err (!%p1693_p2)
}
  0x2a   : > { %s2340_s28 = smov 192   ;;  %s2341_s10 = smov 12  }
  0x2b   : > { %1567 = dma.hbm_to_vmem [thread:$0]  (!%p1934_p11), %s2332_s3, 768, %s238_s11, [#allocation7], %s2340_s28, %s2340_s28, %s2341_s10  }
  0x2c   : > { %p37_p1 = scmp.ge.s32.totalorder %s35_s13, 2  ;;  %s44_s16 = sadd.s32 1, %s1801_s23 }
  0x2d   : > { %p51_p2 = scmp.ne.s32.totalorder %s1801_s23, %s1797_s22  ;;  %p52_p4 = scmp.eq.s32.totalorder %s1813_s26, 0 }
  0x2e   : > { %s2364_s13 = smov (%p37_p1, %s35_s13), 0  ;;  %p2348_p8 = scmp.ne.s32.totalorder %s2343_s30, 0 }
  0x2f   : > { %p53_p6 = por %p52_p4, %p51_p2  ;;  %s39_s12 = ssub.s32 %s1809_s25, %s2364_s13 }
  0x30   : > { %p1966_p10 = por %p2348_p8, %p51_p2  ;;  %p1577_p12 = scmp.lt.s32.totalorder %s1813_s26, 2 }
  0x31   : > { %p42_p13 = scmp.eq.s32.totalorder %s39_s12, 0  ;;  %s257_s18 = sand.u32 1, %s1801_s23  }
  0x32   : > { %s1553_s19 = smul.u32 48, %s257_s18  ;;  %p1978_p11 = pnand %p1577_p12, %p53_p6 }
  0x33   : > { %s1975_s20 = scalar_select %p42_p13, %s1801_s23, %s44_s16  }
  0x34   : > { %s1554_s11 = smul.u32 768, %s1809_s25  ;;  %s261_s27 = scalar_lea.vmem [#allocation3], %s1553_s19 }
  0x35   : > { %s270_s14 = sshll.u32 %s261_s27, 4  ;;  %s1989_s16 = scalar_lea.sflag [#allocation4], %s257_s18  ;;  %s1987_s14 = int_to_ptr.vmem [resolvable:$true] %s270_s14 }
  0x36   : > { %s1985_s10 = scalar_lea.hbm %s2329_s0, %s1554_s11  ;;  %p1699_p3 = pneg %p1978_p11 }
  0x37   : > { %s1697_s12 = scalar_lea.hbm %s1985_s10, 768  ;;  %s1702_s11 = scalar_lea.hbm %s2329_s0, 1536 }
  0x38   : > { %p1698_p0 = scmp.ne.s32.totalorder %s1985_s10, %s1697_s12  ;;  %p1703_p9 = scmp.lt.u32.totalorder %s1985_s10, %s2329_s0 }
  0x39   : > { %p1704_p1 = scmp.lt.u32.totalorder %s1702_s11, %s1697_s12  ;;  %p1706_p4 = scmp.lt.u32.totalorder %s1697_s12, %s1985_s10 }
  0x3a   : > { %p1700_p5 = pnand %p1699_p3, %p1698_p0 }
  0x3b   : > { %p1705_p2 = por %p1704_p1, %p1703_p9 }
  0x3c   : > { %p1701_p7 = pneg %p1700_p5 }
  0x3d   : > { %p1707_p6 = por %p1706_p4, %p1705_p2 }
  0x3f   : > { %p1708_p8 = pnand %p1707_p6, %p1701_p7 }
  0x41   : > { %1711 = shalt.err (!%p1708_p8)
}
  0x42   : > { %s1712_s18 = scalar_lea.vmem %s1987_s14, 768  ;;  %s1818_s28 = smov [#allocation3]  }
  0x43   : > { %p1713_p12 = scmp.ne.s32.totalorder %s1987_s14, %s1712_s18  ;;  %s1717_s19 = sshll.u32 %s1818_s28, 4  ;;  %s1718_s19 = int_to_ptr.vmem [resolvable:$false] %s1717_s19 }
  0x44   : > { %s1719_s27 = scalar_lea.vmem %s1718_s19, 1536  ;;  %p1720_p5 = scmp.lt.s32.totalorder %s1987_s14, %s1718_s19 }
  0x45   : > { %p1715_p13 = pnand %p1713_p12, %p1699_p3  ;;  %p1721_p9 = scmp.lt.s32.totalorder %s1719_s27, %s1712_s18 }
  0x47   : > { %p1716_p0 = pneg %p1715_p13  ;;  %p1722_p1 = por %p1721_p9, %p1720_p5 }
  0x49   : > { %p1723_p2 = pnand %p1722_p1, %p1716_p0 }
  0x4b   : > { %1726 = shalt.err (!%p1723_p2)
}
  0x4c   : > { %s2351_s12 = smov 12   ;;  %s2352_s11 = smov 192  }
  0x4d   : > { %1571 = dma.hbm_to_vmem [thread:$0]  (!%p1978_p11), %s1985_s10, 768, %s1987_s14, %s1989_s16, %s2352_s11, %s2352_s11, %s2351_s12  }
  0x4e   : > { %p2353_p3 = scmp.ne.s32.totalorder %s2346_s9, 0 }
  0x4f   : > { %s2023_s30 = sand.u32 (!%p2353_p3), 1, %s1797_s22   ;;  %p2354_p7 = scmp.ne.s32.totalorder (!%p2353_p3), %s2344_s7, 0 }
  0x50   : > { %282 = sbr.rel (%p2353_p3) target bundleno = 886 (0x376), region = 44  ;;  %s285_s28 = scalar_lea.sflag (!%p2353_p3), [#allocation4], %s2023_s30 }
  0x51   : > { %s1555_s18 = smul.u32 (!%p2353_p3), 48, %s2023_s30 }
  0x53   : > { %s2027_s19 = scalar_lea.vmem (!%p2353_p3), [#allocation3], %s1555_s18 }
  0x57   : > { %1780 = dma.done.wait (%p2354_p7), %s285_s28, 768  }
  0x58   : > { %1782 = vsyncadd (%p2354_p7), %s285_s28, 4294966528  ;;  %p2355_p11 = scmp.ne.s32.totalorder %s2342_s29, 0 }
  0x5a   : > { %1784 = dma.done.wait (%p2355_p11), [#allocation7], 768  }
  0x5b   : > { %1786 = vsyncadd (%p2355_p11), [#allocation7], 4294966528  ;;  %v357_v0 = vlaneseq  ;;  %v1819_v1 = vmov 1966171168   ;;  %v2038_v6 = vld [vmem:[%s2027_s19] sm:$0xff]  ;;  %v2041_v7 = vld [vmem:[%s2027_s19 + $0xc] sm:$0xff] }
  0x5c   : > { %v355_v2 = vunpack.c.l.s4 %v1819_v1  ;;  %v1475_v8 = vld.sshfl [vmem:[%s2331_s2] sm:$0x11 pattern:$0x75316420]  ;;  %v2048_v9 = vcombine.high %v2038_v6, %v2041_v7  ;;  %v2052_v13 = vcombine.low %v2038_v6, %v2041_v7  ;;  %s1820_s14 = smov 127   ;;  %s1821_s15 = smov 2  }
  0x5d   : > { %v358_v3 = vshrl.u32 %v357_v0, 7  ;;  %v491_v11 = vcombine.high %v1475_v8, %v1475_v8  ;;  %v1463_v14 = vld.sshfl [vmem:[%s2330_s1] sm:$0x11 pattern:$0x75316420]  ;;  %v2064_v30 = vld [vmem:[%s2027_s19 + $0x18] sm:$0xff] }
  0x5e   : > { %v356_v4 = vunpack.c.0.s8 %v355_v2  ;;  %452 = vrot.lane.b32.xlu1 %v2048_v9, %s1820_s14  ;;  %v353_v17 = vcombine.high %v1463_v14, %v1463_v14  ;;  %v1651_v24 = vld [vmem:[%s2027_s19 + $0x20] ss:$12 sps:$4 sm:$0xff]   ;;  %v2067_v31 = vld [vmem:[%s2027_s19 + $0x24] sm:$0xff]  ;;  %s1822_s16 = smov 16   ;;  %s1823_s27 = smov 18   ;;  %vm462_vm0 = vcmask 1039360  }
  0x5f   : > { %v373_v10 = vsub.s32 0, %v358_v3  ;;  %v1652_v32 = vld [vmem:[%s2027_s19 + $0x8] ss:$12 sps:$4 sm:$0xff]   ;;  %s1824_s12 = smov 32   ;;  %v2078_v41 = vcombine.high %v2064_v30, %v2067_v31  ;;  %s1825_s11 = smov 111   ;;  %v2085_v42 = vcombine.low %v2064_v30, %v2067_v31  ;;  %vm528_vm1 = vcmask 15360  }
  0x60   : > { %v359_v5 = vsub.s32 %v356_v4, %v358_v3  ;;  %s1826_s18 = smov 34   ;;  %v1656_v43 = vld [vmem:[%s2027_s19 + $0x20] ss:$12 sps:$4 sm:$0xff]   ;;  %v1655_v44 = vld [vmem:[%s2027_s19 + $0x8] ss:$12 sps:$4 sm:$0xff]   ;;  %s1827_s28 = smov 126  }
  0x61   : > { %v480_v49 = vld [vmem:[%s2027_s19 + $0x20] sm:$0xf]  ;;  %v482_v50 = vld [vmem:[%s2027_s19 + $0x2c] sm:$0xf]  ;;  %v476_v51 = vld [vmem:[%s2027_s19 + $0x8] sm:$0xf] }
  0x62   : > { %v498_v12 = vrot.slane %v1475_v8, %v359_v5  ;;  %v505_v15 = vrot.slane %v491_v11, %v359_v5  ;;  %v360_v18 = vrot.slane %v1463_v14, %v359_v5  ;;  %v367_v21 = vrot.slane %v353_v17, %v359_v5  ;;  %450 = vrot.lane.b32.xlu1 %v2052_v13, %s1820_s14  ;;  %v478_v53 = vld [vmem:[%s2027_s19 + $0x14] sm:$0xf]  ;;  %v596_v62 = vld [vmem:[%s2027_s19 + $0x20] sm:$0xf]  ;;  %v598_v0 = vld [vmem:[%s2027_s19 + $0x2c] sm:$0xf] }
  0x63   : > { %v592_v1 = vld [vmem:[%s2027_s19 + $0x8] sm:$0xf]  ;;  %v594_v4 = vld [vmem:[%s2027_s19 + $0x14] sm:$0xf]  ;;  %v729_v5 = vld [vmem:[%s2027_s19 + $0x20] sm:$0xf] }
  0x64   : > { %v507_v16 = vpack.i.b16 %v498_v12, %v498_v12  ;;  %v514_v20 = vpack.i.b16 %v505_v15, %v505_v15  ;;  %v369_v22 = vpack.i.b16 %v360_v18, %v360_v18  ;;  %v376_v26 = vpack.i.b16 %v367_v21, %v367_v21  ;;  %v731_v8 = vld [vmem:[%s2027_s19 + $0x2c] sm:$0xf]  ;;  %v725_v12 = vld [vmem:[%s2027_s19 + $0x8] sm:$0xf]  ;;  %v727_v14 = vld [vmem:[%s2027_s19 + $0x14] sm:$0xf] }
  0x65   : > { %s1828_s7 = smov 112   ;;  %s1829_s9 = smov 110   ;;  %vm602_vm2 = vcmask 130048   ;;  %vm735_vm3 = vcmask 146432   ;;  %vm809_vm4 = vcmask 261120   ;;  %vm942_vm5 = vcmask 277504  }
  0x66   : > { %v512_v19 = vrot.slane %v507_v16, %v373_v10  ;;  %v519_v23 = vrot.slane %v514_v20, %v373_v10  ;;  %v374_v25 = vrot.slane %v369_v22, %v373_v10  ;;  %v381_v28 = vrot.slane %v376_v26, %v373_v10  ;;  %460 = vrot.lane.b32.xlu1 %v1651_v24, %s1820_s14  ;;  %v803_v22 = vld [vmem:[%s2027_s19 + $0x20] sm:$0xf]  ;;  %s1830_s29 = smov 96   ;;  %s1831_s10 = smov 95  }
  0x67   : > { %vm578_vm6 = vcmask 1031168   ;;  %vm652_vm7 = vcmask 916480   ;;  %vm711_vm8 = vcmask 908288   ;;  %vm785_vm9 = vcmask 900096  }
  0x68   : > { %v1476_v27 = vcombine.low %v512_v19, %v519_v23  ;;  %v1464_v29 = vcombine.low %v374_v25, %v381_v28  ;;  %v805_v28 = vld [vmem:[%s2027_s19 + $0x2c] sm:$0xf]  ;;  %vm859_vm10 = vcmask 785408   ;;  %vm992_vm11 = vcmask 769024  }
  0x69   : > { %vm918_vm12 = vcmask 777216  }
  0x6a   : > { %525 = vrot.lane.b32.xlu0 %v1476_v27, %s1821_s15  ;;  %v388_v33 = vmul.bf16 %v1464_v29, %v2038_v6  ;;  %v389_v34 = vmul.bf16 %v1464_v29, %v2041_v7  ;;  %v390_v35 = vmul.bf16 %v1464_v29, %v2064_v30  ;;  %v391_v36 = vmul.bf16 %v1464_v29, %v2067_v31 }
  0x6b   : > { %732 = vrot.lane.b32.xlu1 %v1476_v27, %s1823_s27 }
  0x6c   : > { %v1466_v37 = vcombine.high %v388_v33, %v389_v34  ;;  %v1465_v38 = vcombine.low %v388_v33, %v389_v34  ;;  %v1468_v39 = vcombine.high %v390_v35, %v391_v36  ;;  %v1467_v40 = vcombine.low %v390_v35, %v391_v36 }
  0x6e   : > { %599 = vrot.lane.b32.xlu0 %v1464_v29, %s1822_s16  ;;  %1110 = vmatprep.subr.bf16.mxu0 %v1466_v37 }
  0x6f   : > { %1111 = vmatpush1.bf16.msra.mxu0 %v1465_v38  ;;  %806 = vrot.lane.b32.xlu1 %v1464_v29, %s1824_s12  ;;  %v799_v29 = vld [vmem:[%s2027_s19 + $0x8] sm:$0xf]  ;;  %s1536_s12 = sshll.u32 %s1805_s24, 10 }
  0x70   : > { %1112 = vmatprep.subr.bf16.mxu0 %v1468_v39 }
  0x72   : > { %454 = vrot.lane.b32.xlu0 %v1652_v32, %s1820_s14  ;;  %v801_v32 = vld [vmem:[%s2027_s19 + $0x14] sm:$0xf] }
  0x73   : > { %1113 = vmatpush1.bf16.msra.mxu0 %v1467_v40  ;;  %701 = vrot.lane.b32.xlu1 %v2048_v9, %s1825_s11 }
  0x76   : > { %458 = vrot.lane.b32.xlu0 %v2078_v41, %s1820_s14 }
  0x77   : > { %699 = vrot.lane.b32.xlu1 %v2052_v13, %s1825_s11 }
  0x7a   : > { %939 = vrot.lane.b32.xlu0 %v1476_v27, %s1826_s18 }
  0x7b   : > { %709 = vrot.lane.b32.xlu1 %v1656_v43, %s1825_s11 }
  0x7e   : > { %456 = vrot.lane.b32.xlu0 %v2085_v42, %s1820_s14  ;;  %s1832_s14 = smov 94  }
  0x82   : > { %703 = vrot.lane.b32.xlu0 %v1655_v44, %s1825_s11 }
  0x86   : > { %707 = vrot.lane.b32.xlu0 %v2078_v41, %s1825_s11 }
  0x8a   : > { %705 = vrot.lane.b32.xlu0 %v2085_v42, %s1825_s11 }
  0xd0   : > { %v453_v45 = vpop.permute.xlu1 %452 }
  0xd4   : > { %v451_v46 = vpop.permute.xlu1 %450 }
  0xd5   : > { %v463_v19 = vsel %vm462_vm0, %v451_v46, %v453_v45 }
  0xd8   : > { %v461_v48 = vpop.permute.xlu1 %460 }
  0xdc   : > { %v2094_v47 = vpop.permute.xlu0 %525 }
  0xdd   : > { %v527_v52 = vrot.slane %v2094_v47, 4  ;;  %v2103_v58 = vpop.permute.xlu1 %732 }
  0xde   : > { %v2117_v10 = vrot.slane %v2103_v58, 4 }
  0xdf   : > { %v537_v54 = vmul.bf16 %v527_v52, %v480_v49  ;;  %v539_v55 = vmul.bf16 %v527_v52, %v482_v50  ;;  %v533_v56 = vmul.bf16 %v527_v52, %v476_v51  ;;  %v535_v61 = vmul.bf16 %v527_v52, %v478_v53 }
  0xe0   : > { %v2101_v57 = vpop.permute.xlu0 %599  ;;  %v744_v20 = vmul.bf16 %v2117_v10, %v729_v5  ;;  %v746_v21 = vmul.bf16 %v2117_v10, %v731_v8  ;;  %v740_v26 = vmul.bf16 %v2117_v10, %v725_v12  ;;  %v742_v27 = vmul.bf16 %v2117_v10, %v727_v14 }
  0xe1   : > { %v2106_v59 = vrot.slane %v2101_v57, 4  ;;  %v1482_v60 = vcombine.low %v537_v54, %v539_v55  ;;  %v1479_v63 = vcombine.low %v533_v56, %v535_v61  ;;  %v2120_v11 = vpop.permute.xlu1 %806  ;;  %v529_v44 = vsel %vm528_vm1, %v527_v52, %v2094_v47 }
  0xe2   : > { %v2133_v23 = vrot.slane %v2120_v11, 4  ;;  %v1500_v35 = vcombine.low %v744_v20, %v746_v21  ;;  %v1497_v38 = vcombine.low %v740_v26, %v742_v27  ;;  %v532_v46 = vmul.bf16 %v529_v44, %v2038_v6 }
  0xe3   : > { %576 = vrot.lane.b32.xlu1 %v1482_v60, %s1827_s28  ;;  %v611_v3 = vmul.bf16 %v2106_v59, %v596_v62  ;;  %570 = vrot.lane.b32.xlu0 %v1479_v63, %s1827_s28  ;;  %v613_v16 = vmul.bf16 %v2106_v59, %v598_v0  ;;  %v607_v17 = vmul.bf16 %v2106_v59, %v592_v1  ;;  %v1657_v63 = vld [vmem:[%s2027_s19 + $0x8] ss:$12 sps:$4 sm:$0xff]  }
  0xe4   : > { %v455_v2 = vpop.permute.xlu0 %454  ;;  %v609_v18 = vmul.bf16 %v2106_v59, %v594_v4  ;;  %v818_v36 = vmul.bf16 %v2133_v23, %v803_v22  ;;  %v820_v37 = vmul.bf16 %v2133_v23, %v805_v28  ;;  %v814_v39 = vmul.bf16 %v2133_v23, %v799_v29  ;;  %v934_v22 = vld [vmem:[%s2027_s19 + $0x14] sm:$0xf] }
  0xe5   : > { %v464_v15 = vsel %vm462_vm0, %v453_v45, %v455_v2  ;;  %v1488_v24 = vcombine.low %v611_v3, %v613_v16  ;;  %v816_v40 = vmul.bf16 %v2133_v23, %v801_v32  ;;  %v536_v51 = vmul.bf16 %v529_v44, %v2064_v30 }
  0xe6   : > { %1114 = vmatprep.subr.bf16.mxu0 %v464_v15  ;;  %v1485_v33 = vcombine.low %v607_v17, %v609_v18  ;;  %v1506_v45 = vcombine.low %v818_v36, %v820_v37  ;;  %v538_v53 = vmul.bf16 %v529_v44, %v2067_v31  ;;  %v603_v54 = vsel %vm602_vm2, %v2106_v59, %v2101_v57  ;;  %v1658_v18 = vld [vmem:[%s2027_s19 + $0x20] ss:$12 sps:$4 sm:$0xff]  }
  0xe7   : > { %1115 = vmatpush1.bf16.msra.mxu0 %v463_v19  ;;  %650 = vrot.lane.b32.xlu1 %v1488_v24, %s1828_s7  ;;  %v1503_v49 = vcombine.low %v814_v39, %v816_v40  ;;  %v606_v56 = vmul.bf16 %v603_v54, %v2038_v6  ;;  %v608_v60 = vmul.bf16 %v603_v54, %v2041_v7  ;;  %v1661_v36 = vld [vmem:[#allocation6 + $0x4] ss:$12 sps:$4 sm:$0xff]  }
  0xe8   : > { %v459_v25 = vpop.permute.xlu0 %458  ;;  %644 = vrot.lane.b32.xlu0 %v1485_v33, %s1828_s7  ;;  %v1481_v55 = vcombine.high %v536_v51, %v538_v53  ;;  %v1480_v62 = vcombine.low %v536_v51, %v538_v53  ;;  %v610_v1 = vmul.bf16 %v603_v54, %v2064_v30  ;;  %v612_v57 = vmul.bf16 %v603_v54, %v2067_v31  ;;  %v936_v37 = vld [vmem:[%s2027_s19 + $0x20] sm:$0xf] }
  0xe9   : > { %v466_v34 = vsel %vm462_vm0, %v459_v25, %v461_v48  ;;  %v534_v48 = vmul.bf16 %v529_v44, %v2041_v7  ;;  %v1484_v0 = vcombine.high %v606_v56, %v608_v60  ;;  %v1483_v59 = vcombine.low %v606_v56, %v608_v60  ;;  %1142 = vmatprep.mubr.bf16.mxu0 %v1661_v36 }
  0xea   : > { %1116 = vmatprep.subr.bf16.mxu0 %v466_v34  ;;  %v1487_v2 = vcombine.high %v610_v1, %v612_v57  ;;  %v736_v3 = vsel %vm735_vm3, %v2117_v10, %v2103_v58  ;;  %v1486_v8 = vcombine.low %v610_v1, %v612_v57 }
  0xeb   : > { %783 = vrot.lane.b32.xlu1 %v1500_v35, %s1829_s9  ;;  %v1478_v52 = vcombine.high %v532_v46, %v534_v48  ;;  %v1477_v61 = vcombine.low %v532_v46, %v534_v48  ;;  %v743_v4 = vmul.bf16 %v736_v3, %v2064_v30  ;;  %v745_v5 = vmul.bf16 %v736_v3, %v2067_v31 }
  0xec   : > { %v2147_v43 = vpop.permute.xlu0 %939  ;;  %777 = vrot.lane.b32.xlu0 %v1497_v38, %s1829_s9  ;;  %v739_v12 = vmul.bf16 %v736_v3, %v2038_v6  ;;  %v741_v14 = vmul.bf16 %v736_v3, %v2041_v7  ;;  %v938_v38 = vld [vmem:[%s2027_s19 + $0x2c] sm:$0xf] }
  0xed   : > { %v1499_v15 = vcombine.high %v743_v4, %v745_v5  ;;  %v1498_v10 = vcombine.low %v743_v4, %v745_v5  ;;  %v941_v19 = vrot.slane %v2147_v43, 4 }
  0xee   : > { %v1496_v58 = vcombine.high %v739_v12, %v741_v14 }
  0xef   : > { %857 = vrot.lane.b32.xlu1 %v1506_v45, %s1830_s29  ;;  %v943_v24 = vsel %vm942_vm5, %v941_v19, %v2147_v43  ;;  %v949_v27 = vmul.bf16 %v941_v19, %v934_v22  ;;  %v951_v43 = vmul.bf16 %v941_v19, %v936_v37  ;;  %v953_v44 = vmul.bf16 %v941_v19, %v938_v38 }
  0xf0   : > { %v457_v50 = vpop.permute.xlu0 %456  ;;  %851 = vrot.lane.b32.xlu0 %v1503_v49, %s1830_s29  ;;  %v946_v28 = vmul.bf16 %v943_v24, %v2038_v6  ;;  %v948_v29 = vmul.bf16 %v943_v24, %v2041_v7  ;;  %v952_v39 = vmul.bf16 %v943_v24, %v2067_v31  ;;  %v702_v49 = vpop.permute.xlu1 %701 }
  0xf1   : > { %v465_v47 = vsel %vm462_vm0, %v457_v50, %v459_v25  ;;  %v1518_v46 = vcombine.low %v951_v43, %v953_v44 }
  0xf2   : > { %1117 = vmatpush1.bf16.msra.mxu0 %v465_v47  ;;  %v1514_v35 = vcombine.high %v946_v28, %v948_v29  ;;  %v1513_v40 = vcombine.low %v946_v28, %v948_v29 }
  0xf3   : > { %568 = vrot.lane.b32.xlu1 %v1478_v52, %s1827_s28 }
  0xf4   : > { %574 = vrot.lane.b32.xlu0 %v1481_v55, %s1827_s28  ;;  %v704_v50 = vpop.permute.xlu0 %703  ;;  %v700_v51 = vpop.permute.xlu1 %699 }
  0xf7   : > { %566 = vrot.lane.b32.xlu1 %v1477_v61, %s1827_s28 }
  0xf8   : > { %572 = vrot.lane.b32.xlu0 %v1480_v62, %s1827_s28  ;;  %v708_v53 = vpop.permute.xlu0 %707  ;;  %v710_v47 = vpop.permute.xlu1 %709  ;;  %s2279_s28 = scalar_lea.hbm %s2335_s6, %s1536_s12 }
  0xf9   : > { %v715_v22 = vsel %vm711_vm8, %v708_v53, %v710_v47 }
  0xfb   : > { %642 = vrot.lane.b32.xlu1 %v1484_v0, %s1828_s7 }
  0xfc   : > { %910 = vrot.lane.b32.xlu0 %v1657_v63, %s1831_s10  ;;  %v706_v52 = vpop.permute.xlu0 %705 }
  0xff   : > { %640 = vrot.lane.b32.xlu1 %v1483_v59, %s1828_s7 }
 0x100   : > { %648 = vrot.lane.b32.xlu0 %v1487_v2, %s1828_s7 }
 0x103   : > { %908 = vrot.lane.b32.xlu1 %v2048_v9, %s1831_s10  ;;  %v810_v9 = vsel %vm809_vm4, %v2133_v23, %v2120_v11  ;;  %v932_v11 = vld [vmem:[%s2027_s19 + $0x8] sm:$0xf]  ;;  %s1462_s19 = sshll.u32 %s2023_s30, 6 }
 0x104   : > { %646 = vrot.lane.b32.xlu0 %v1486_v8, %s1828_s7  ;;  %v813_v16 = vmul.bf16 %v810_v9, %v2038_v6  ;;  %v815_v17 = vmul.bf16 %v810_v9, %v2041_v7  ;;  %v817_v20 = vmul.bf16 %v810_v9, %v2064_v30  ;;  %v819_v21 = vmul.bf16 %v810_v9, %v2067_v31  ;;  %v1050_v31 = vld [vmem:[%s2333_s4 + $0x8] sm:$0xff]  ;;  %s328_s15 = scalar_lea.vmem [#allocation8], %s1462_s19  ;;  %s1310_s7 = scalar_lea.sflag [#allocation5], %s2023_s30 }
 0x105   : > { %v947_v26 = vmul.bf16 %v941_v19, %v932_v11  ;;  %v1833_v6 = vmov 0   ;;  %v950_v7 = vmul.bf16 %v943_v24, %v2064_v30  ;;  %v1049_v30 = vld [vmem:[%s2333_s4] sm:$0xff]  ;;  %v713_v19 = vsel %vm711_vm8, %v702_v49, %v704_v50  ;;  %s1325_s27 = sshll.u32 %s328_s15, 4  ;;  %s2274_s27 = int_to_ptr.vmem [resolvable:$true] %s1325_s27 }
 0x106   : > { %v1502_v23 = vcombine.high %v813_v16, %v815_v17  ;;  %v1505_v25 = vcombine.high %v817_v20, %v819_v21  ;;  %v1501_v32 = vcombine.low %v813_v16, %v815_v17  ;;  %v1504_v33 = vcombine.low %v817_v20, %v819_v21  ;;  %1195 = vmatprep.mubr.bf16.mxu1 %v1833_v6  ;;  %s1727_s24 = scalar_lea.vmem %s2274_s27, 1024 }
 0x107   : > { %906 = vrot.lane.b32.xlu1 %v2052_v13, %s1831_s10  ;;  %v1495_v13 = vcombine.low %v739_v12, %v741_v14  ;;  %v1515_v34 = vcombine.low %v947_v26, %v949_v27  ;;  %1648 = vset.pattern.permute.xlu0 %v1833_v6  ;;  %v1517_v45 = vcombine.high %v950_v7, %v952_v39  ;;  %p1728_p4 = scmp.ne.s32.totalorder %s2274_s27, %s1727_s24 }
 0x108   : > { %781 = vrot.lane.b32.xlu0 %v1499_v15, %s1829_s9  ;;  %1647 = vset.pattern.permute.xlu1 %v1833_v6  ;;  %v1516_v48 = vcombine.low %v950_v7, %v952_v39  ;;  %v712_v11 = vsel %vm711_vm8, %v700_v51, %v702_v49  ;;  %v714_v26 = vsel %vm711_vm8, %v706_v52, %v708_v53  ;;  %v1659_v53 = vld [vmem:[#allocation6] ss:$12 sps:$4 sm:$0xff]   ;;  %v1663_v52 = vld [vmem:[#allocation6 + $0x1c] ss:$12 sps:$4 sm:$0xff]  }
 0x109   : > { %p1729_p6 = pnand %p1728_p4, %p1966_p10 }
 0x10b   : > { %775 = vrot.lane.b32.xlu1 %v1496_v58, %s1829_s9  ;;  %p1730_p8 = pneg %p1729_p6 }
 0x10c   : > { %779 = vrot.lane.b32.xlu0 %v1498_v10, %s1829_s9 }
 0x10f   : > { %773 = vrot.lane.b32.xlu1 %v1495_v13, %s1829_s9  ;;  %s1834_s9 = smov [#allocation8]  }
 0x110   : > { %916 = vrot.lane.b32.xlu0 %v1658_v18, %s1831_s10 }
 0x113   : > { %849 = vrot.lane.b32.xlu1 %v1502_v23, %s1830_s29 }
 0x114   : > { %855 = vrot.lane.b32.xlu0 %v1505_v25, %s1830_s29 }
 0x117   : > { %847 = vrot.lane.b32.xlu1 %v1501_v32, %s1830_s29 }
 0x118   : > { %853 = vrot.lane.b32.xlu0 %v1504_v33, %s1830_s29  ;;  %s1731_s29 = sshll.u32 %s1834_s9, 4  ;;  %s1732_s29 = int_to_ptr.vmem [resolvable:$false] %s1731_s29 }
 0x119   : > { %p1734_p12 = scmp.lt.s32.totalorder %s2274_s27, %s1732_s29 }
 0x11b   : > { %984 = vrot.lane.b32.xlu1 %v1515_v34, %s1832_s14 }
 0x11c   : > { %982 = vrot.lane.b32.xlu0 %v1514_v35, %s1832_s14 }
 0x11f   : > { %914 = vrot.lane.b32.xlu1 %v2078_v41, %s1831_s10  ;;  %v1051_v41 = vld [vmem:[%s2333_s4 + $0x10] sm:$0xff] }
 0x120   : > { %980 = vrot.lane.b32.xlu0 %v1513_v40, %s1832_s14 }
 0x123   : > { %912 = vrot.lane.b32.xlu1 %v2085_v42, %s1831_s10  ;;  %v1052_v42 = vld [vmem:[%s2333_s4 + $0x18] sm:$0xff]  ;;  %s1733_s10 = scalar_lea.vmem %s1732_s29, 2048 }
 0x124   : > { %988 = vrot.lane.b32.xlu0 %v1517_v45, %s1832_s14  ;;  %p1735_p13 = scmp.lt.s32.totalorder %s1733_s10, %s1727_s24 }
 0x126   : > { %p1736_p0 = por %p1735_p13, %p1734_p12 }
 0x127   : > { %990 = vrot.lane.b32.xlu1 %v1518_v46, %s1832_s14 }
 0x128   : > { %986 = vrot.lane.b32.xlu0 %v1516_v48, %s1832_s14  ;;  %p1737_p5 = pnand %p1736_p0, %p1730_p8 }
 0x12b   : > { %1055 = vperm.xlu1 %1647, %v1049_v30  }
 0x12c   : > { %1060 = vperm.xlu0 %1648, %v1050_v31  }
 0x12f   : > { %1065 = vperm.xlu1 %1647, %v1051_v41  }
 0x133   : > { %1070 = vperm.xlu1 %1647, %v1052_v42  }
 0x155   : > { %v577_v54 = vpop.permute.xlu1 %576  ;;  %v571_v55 = vpop.permute.xlu0 %570 }
 0x159   : > { %v651_v56 = vpop.permute.xlu1 %650 }
 0x15a   : > { %v645_v60 = vpop.permute.xlu0 %644 }
 0x15d   : > { %v784_v61 = vpop.permute.xlu1 %783 }
 0x15e   : > { %v778_v62 = vpop.permute.xlu0 %777 }
 0x161   : > { %v2232_v63 = vpop.permute.xlu1 %857 }
 0x162   : > { %v852_v0 = vpop.permute.xlu0 %851 }
 0x165   : > { %v569_v1 = vpop.permute.xlu1 %568 }
 0x166   : > { %v580_v57 = vsel %vm578_vm6, %v569_v1, %v571_v55  ;;  %v575_v59 = vpop.permute.xlu0 %574 }
 0x167   : > { %1118 = vmatprep.subr.bf16.mxu0 %v580_v57  ;;  %v582_v5 = vsel %vm578_vm6, %v575_v59, %v577_v54 }
 0x169   : > { %v567_v2 = vpop.permute.xlu1 %566 }
 0x16a   : > { %v579_v3 = vsel %vm578_vm6, %v567_v2, %v569_v1  ;;  %v573_v4 = vpop.permute.xlu0 %572 }
 0x16b   : > { %1119 = vmatpush1.bf16.msra.mxu0 %v579_v3  ;;  %v581_v12 = vsel %vm578_vm6, %v573_v4, %v575_v59 }
 0x16c   : > { %1120 = vmatprep.subr.bf16.mxu0 %v582_v5 }
 0x16d   : > { %v643_v8 = vpop.permute.xlu1 %642 }
 0x16e   : > { %v654_v14 = vsel %vm652_vm7, %v643_v8, %v645_v60  ;;  %v911_v15 = vpop.permute.xlu0 %910  ;;  %v1662_v60 = vld [vmem:[#allocation6 + $0x8] ss:$12 sps:$4 sm:$0xff]  }
 0x16f   : > { %1121 = vmatpush1.bf16.msra.mxu0 %v581_v12 }
 0x170   : > { %1122 = vmatprep.subr.bf16.mxu0 %v654_v14 }
 0x171   : > { %v641_v58 = vpop.permute.xlu1 %640 }
 0x172   : > { %v653_v9 = vsel %vm652_vm7, %v641_v58, %v643_v8  ;;  %v649_v10 = vpop.permute.xlu0 %648 }
 0x173   : > { %1123 = vmatpush1.bf16.msra.mxu0 %v653_v9  ;;  %v656_v16 = vsel %vm652_vm7, %v649_v10, %v651_v56 }
 0x174   : > { %1124 = vmatprep.subr.bf16.mxu0 %v656_v16 }
 0x175   : > { %v909_v17 = vpop.permute.xlu1 %908 }
 0x176   : > { %v647_v18 = vpop.permute.xlu0 %646  ;;  %v920_v46 = vsel %vm918_vm12, %v909_v17, %v911_v15 }
 0x177   : > { %v655_v13 = vsel %vm652_vm7, %v647_v18, %v649_v10 }
 0x178   : > { %1125 = vmatpush1.bf16.msra.mxu0 %v655_v13 }
 0x179   : > { %v907_v20 = vpop.permute.xlu1 %906  ;;  %1126 = vmatprep.subr.bf16.mxu0 %v713_v19 }
 0x17a   : > { %v782_v21 = vpop.permute.xlu0 %781  ;;  %v919_v41 = vsel %vm918_vm12, %v907_v20, %v909_v17 }
 0x17b   : > { %v789_v32 = vsel %vm785_vm9, %v782_v21, %v784_v61  ;;  %v1665_v61 = vld [vmem:[#allocation6 + $0x18] ss:$12 sps:$4 sm:$0xff]  }
 0x17c   : > { %1127 = vmatpush1.bf16.msra.mxu0 %v712_v11 }
 0x17d   : > { %v776_v23 = vpop.permute.xlu1 %775  ;;  %1128 = vmatprep.subr.bf16.mxu0 %v715_v22 }
 0x17e   : > { %v780_v24 = vpop.permute.xlu0 %779  ;;  %v787_v25 = vsel %vm785_vm9, %v776_v23, %v778_v62  ;;  %v1666_v62 = vld [vmem:[#allocation6 + $0x20] ss:$12 sps:$4 sm:$0xff]  }
 0x17f   : > { %v788_v36 = vsel %vm785_vm9, %v780_v24, %v782_v21 }
 0x180   : > { %1129 = vmatpush1.bf16.msra.mxu0 %v714_v26 }
 0x181   : > { %v774_v27 = vpop.permute.xlu1 %773  ;;  %1130 = vmatprep.subr.bf16.mxu0 %v787_v25 }
 0x182   : > { %v786_v28 = vsel %vm785_vm9, %v774_v27, %v776_v23  ;;  %v917_v29 = vpop.permute.xlu0 %916 }
 0x184   : > { %1131 = vmatpush1.bf16.msra.mxu0 %v786_v28 }
 0x185   : > { %v850_v33 = vpop.permute.xlu1 %849  ;;  %1132 = vmatprep.subr.bf16.mxu0 %v789_v32 }
 0x186   : > { %v856_v34 = vpop.permute.xlu0 %855  ;;  %v861_v35 = vsel %vm859_vm10, %v850_v33, %v852_v0 }
 0x187   : > { %v863_v39 = vsel %vm859_vm10, %v856_v34, %v2232_v63 }
 0x188   : > { %1133 = vmatpush1.bf16.msra.mxu0 %v788_v36 }
 0x189   : > { %v848_v37 = vpop.permute.xlu1 %847  ;;  %1134 = vmatprep.subr.bf16.mxu0 %v861_v35 }
 0x18a   : > { %v860_v38 = vsel %vm859_vm10, %v848_v37, %v850_v33  ;;  %v854_v7 = vpop.permute.xlu0 %853 }
 0x18b   : > { %v862_v44 = vsel %vm859_vm10, %v854_v7, %v856_v34 }
 0x18c   : > { %1135 = vmatpush1.bf16.msra.mxu0 %v860_v38 }
 0x18d   : > { %v985_v40 = vpop.permute.xlu1 %984  ;;  %1136 = vmatprep.subr.bf16.mxu0 %v863_v39 }
 0x18e   : > { %v983_v43 = vpop.permute.xlu0 %982 }
 0x18f   : > { %v994_v45 = vsel %vm992_vm11, %v983_v43, %v985_v40 }
 0x190   : > { %1137 = vmatpush1.bf16.msra.mxu0 %v862_v44  ;;  %1163 = vmatprep.subr.bf16.mxu1 %v994_v45 }
 0x191   : > { %v915_v48 = vpop.permute.xlu1 %914  ;;  %1138 = vmatprep.subr.bf16.mxu0 %v920_v46 }
 0x192   : > { %v981_v30 = vpop.permute.xlu0 %980  ;;  %v922_v31 = vsel %vm918_vm12, %v915_v48, %v917_v29 }
 0x193   : > { %v993_v42 = vsel %vm992_vm11, %v981_v30, %v983_v43 }
 0x194   : > { %1139 = vmatpush1.bf16.msra.mxu0 %v919_v41  ;;  %1164 = vmatpush1.bf16.msra.mxu1 %v993_v42  ;;  %v1668_v41 = vld [vmem:[%s2334_s5 + $0x8] sm:$0xff]  }
 0x195   : > { %v913_v49 = vpop.permute.xlu1 %912  ;;  %1140 = vmatprep.subr.bf16.mxu0 %v922_v31  ;;  %v1667_v31 = vld [vmem:[%s2334_s5] sm:$0xff]  }
 0x196   : > { %v921_v50 = vsel %vm918_vm12, %v913_v49, %v915_v48  ;;  %v989_v51 = vpop.permute.xlu0 %988 }
 0x198   : > { %1141 = vmatpush1.bf16.msra.mxu0 %v921_v50 }
 0x199   : > { %v991_v47 = vpop.permute.xlu1 %990 }
 0x19a   : > { %v996_v54 = vsel %vm992_vm11, %v989_v51, %v991_v47  ;;  %v987_v55 = vpop.permute.xlu0 %986 }
 0x19b   : > { %1165 = vmatprep.subr.bf16.mxu1 %v996_v54  ;;  %1143 = vmatmul.mubr.bf16.vlgmr.msra.gmra.mrb[0].mxu0 %v1659_v53  ;;  %v995_v56 = vsel %vm992_vm11, %v987_v55, %v989_v51 }
 0x19c   : > { %1166 = vmatpush1.bf16.msra.mxu1 %v995_v56  ;;  %1152 = vmatprep.mubr.bf16.mxu0 %v1663_v52 }
 0x19f   : > { %1525 = vmatmul.mubr.msk.bf16.vlgmr.msra.gmra.mrb[0].mxu1 %vm809_vm4, %v1662_v60 }
 0x1a0   : > { %1205 = vmatprep.mubr.bf16.mxu1 %v1833_v6 }
 0x1a3   : > { %1153 = vmatmul.mubr.bf16.gmra.mrb[4].mxu0 %v1665_v61 }
 0x1a7   : > { %1526 = vmatmul.mubr.msk.bf16.gmra.mrb[4].mxu1 %vm809_vm4, %v1666_v62 }
 0x1a8   : > { %1280 = vmatprep.mubr.bf16.mxu1 %v1833_v6 }
 0x1aa   : > { %v1056_v63 = vpop.permute.xlu1 %1055 }
 0x1ab   : > { %v1061_v3 = vpop.permute.xlu0 %1060 }
 0x1ae   : > { %v1066_v15 = vpop.permute.xlu1 %1065 }
 0x1b2   : > { %v1071_v27 = vpop.permute.xlu1 %1070 }
 0x26e   : > { %v1144_v0 = vpop.f32.mrb[0].mxu0 }
 0x26f   : > { %v1145_v1 = vadd.f32 %v1144_v0, %v1056_v63  ;;  %v1146_v57 = vpop.f32.mrb[1].mxu0 }
 0x270   : > { %v1147_v59 = vadd.f32 %v1146_v57, %v1056_v63  ;;  %v1148_v2 = vpop.f32.mrb[2].mxu0 }
 0x271   : > { %v1150_v4 = vpop.f32.mrb[3].mxu0  ;;  %v1149_v8 = vadd.f32 %v1148_v2, %v1061_v3 }
 0x272   : > { %v1197_v5 = vpop.f32.mrb[0].mxu1  ;;  %v1151_v58 = vadd.f32 %v1150_v4, %v1061_v3 }
 0x273   : > { %v1198_v12 = vadd.f32 %v1197_v5, %v1145_v1  ;;  %v1199_v14 = vpop.f32.mrb[1].mxu1 }
 0x274   : > { %v1200_v9 = vadd.f32 %v1199_v14, %v1147_v59  ;;  %v1201_v10 = vpop.f32.mrb[2].mxu1 }
 0x275   : > { %v1202_v16 = vadd.f32 %v1201_v10, %v1149_v8  ;;  %v1203_v17 = vpop.f32.mrb[3].mxu1  ;;  %v1216_v19 = vmax.f32 %v1198_v12, 0.0 }
 0x276   : > { %v1154_v18 = vpop.f32.mrb[4].mxu0  ;;  %v1204_v13 = vadd.f32 %v1203_v17, %v1151_v58  ;;  %v1217_v11 = vmax.f32 %v1200_v9, 0.0 }
 0x277   : > { %v1218_v20 = vmax.f32 %v1202_v16, 0.0  ;;  %v1156_v21 = vpop.f32.mrb[5].mxu0  ;;  %v1155_v25 = vadd.f32 %v1154_v18, %v1066_v15 }
 0x278   : > { %v1219_v22 = vmax.f32 %v1204_v13, 0.0  ;;  %v1158_v23 = vpop.f32.mrb[6].mxu0  ;;  %v1157_v29 = vadd.f32 %v1156_v21, %v1066_v15 }
 0x279   : > { %v1224_v24 = vpack.c.bf16 %v1218_v20, %v1216_v19  ;;  %v1160_v26 = vpop.f32.mrb[7].mxu0  ;;  %v1159_v33 = vadd.f32 %v1158_v23, %v1071_v27 }
 0x27a   : > { %v1225_v28 = vpack.c.bf16 %v1219_v22, %v1217_v11  ;;  %v1207_v32 = vpop.f32.mrb[4].mxu1  ;;  %v1161_v36 = vadd.f32 %v1160_v26, %v1071_v27 }
 0x27b   : > { %v1208_v34 = vadd.f32 %v1207_v32, %v1155_v25  ;;  %v1209_v35 = vpop.f32.mrb[5].mxu1 }
 0x27c   : > { %v1210_v37 = vadd.f32 %v1209_v35, %v1157_v29  ;;  %v1211_v38 = vpop.f32.mrb[6].mxu1  ;;  %1248 = vmatprep.subr.bf16.mxu1 %v1225_v28 }
 0x27d   : > { %v1212_v7 = vadd.f32 %v1211_v38, %v1159_v33  ;;  %v1213_v39 = vpop.f32.mrb[7].mxu1  ;;  %1249 = vmatpush1.bf16.msra.mxu1 %v1224_v24  ;;  %v1220_v43 = vmax.f32 %v1208_v34, 0.0 }
 0x27e   : > { %v1214_v40 = vadd.f32 %v1213_v39, %v1161_v36  ;;  %v1221_v45 = vmax.f32 %v1210_v37, 0.0 }
 0x27f   : > { %v1222_v44 = vmax.f32 %v1212_v7, 0.0 }
 0x280   : > { %v1223_v46 = vmax.f32 %v1214_v40, 0.0 }
 0x281   : > { %v1226_v48 = vpack.c.bf16 %v1222_v44, %v1220_v43 }
 0x282   : > { %v1227_v30 = vpack.c.bf16 %v1223_v46, %v1221_v45 }
 0x284   : > { %1250 = vmatprep.subr.bf16.mxu1 %v1227_v30 }
 0x285   : > { %1251 = vmatpush1.bf16.msra.mxu1 %v1226_v48 }
 0x288   : > { %1529 = vmatmul.mubr.msk.bf16.vlgmr.msra.gmra.mrb[8].mxu1 %vm809_vm4, %v1667_v31 }
 0x289   : > { %1290 = vmatprep.mubr.bf16.mxu1 %v1833_v6 }
 0x290   : > { %1530 = vmatmul.mubr.msk.bf16.gmra.mrb[12].mxu1 %vm809_vm4, %v1668_v41 }
 0x35b   : > { %v1282_v42 = vpop.f32.mrb[8].mxu1 }
 0x35c   : > { %1301 = vst [vmem:[%s328_s15] sm:$0xff] %v1282_v42  ;;  %v1284_v49 = vpop.f32.mrb[9].mxu1 }
 0x35d   : > { %1302 = vst [vmem:[%s328_s15 + $0x8] sm:$0xff] %v1284_v49  ;;  %v1286_v50 = vpop.f32.mrb[10].mxu1 }
 0x35e   : > { %1303 = vst [vmem:[%s328_s15 + $0x10] sm:$0xff] %v1286_v50  ;;  %v1288_v51 = vpop.f32.mrb[11].mxu1 }
 0x35f   : > { %1304 = vst [vmem:[%s328_s15 + $0x18] sm:$0xff] %v1288_v51 }
 0x363   : > { %v1292_v6 = vpop.f32.mrb[12].mxu1 }
 0x364   : > { %1305 = vst [vmem:[%s328_s15 + $0x20] sm:$0xff] %v1292_v6  ;;  %v1294_v53 = vpop.f32.mrb[13].mxu1 }
 0x365   : > { %1306 = vst [vmem:[%s328_s15 + $0x28] sm:$0xff] %v1294_v53  ;;  %v1296_v47 = vpop.f32.mrb[14].mxu1 }
 0x366   : > { %1307 = vst [vmem:[%s328_s15 + $0x30] sm:$0xff] %v1296_v47  ;;  %v1298_v52 = vpop.f32.mrb[15].mxu1 }
 0x367   : > { %1308 = vst [vmem:[%s328_s15 + $0x38] sm:$0xff] %v1298_v52 }
 0x368   : > { %1740 = shalt.err (!%p1737_p5)
}
 0x369   : > { %s1741_s14 = scalar_lea.hbm %s2279_s28, 1024  ;;  %s1745_s12 = scalar_lea.hbm %s2335_s6, 2048 }
 0x36a   : > { %p1742_p9 = scmp.ne.s32.totalorder %s2279_s28, %s1741_s14  ;;  %p1746_p3 = scmp.lt.u32.totalorder %s2279_s28, %s2335_s6 }
 0x36b   : > { %p1747_p7 = scmp.lt.u32.totalorder %s1745_s12, %s1741_s14  ;;  %p1749_p4 = scmp.lt.u32.totalorder %s1741_s14, %s2279_s28 }
 0x36c   : > { %p1743_p1 = pnand %p1742_p9, %p1966_p10 }
 0x36d   : > { %p1748_p11 = por %p1747_p7, %p1746_p3 }
 0x36e   : > { %p1744_p2 = pneg %p1743_p1 }
 0x36f   : > { %p1750_p6 = por %p1749_p4, %p1748_p11 }
 0x371   : > { %p1751_p8 = pnand %p1750_p6, %p1744_p2 }
 0x373   : > { %1754 = shalt.err (!%p1751_p8)
}
 0x374   : > { %s1835_s24 = smov 256  }
 0x375   : > { %1562 = dma.vmem_to_hbm [thread:$0]  (%p1966_p10), %s2274_s27, 1024, %s2279_s28, %s1310_s7, %s1835_s24, %s1835_s24, %s1822_s16  }
 0x376 PF: > { %s1340_s9 = sand.u32 1, %s1793_s21   ;;  %p2356_p12 = scmp.ne.s32.totalorder %s2345_s8, 0 }
 0x377   : > { %p2357_p13 = scmp.ge.s32.totalorder %s1813_s26, 2  ;;  %s1341_s29 = scalar_lea.sflag [#allocation5], %s1340_s9 }
 0x379   : > { %p1573_p0 = pnand %p2357_p13, %p2356_p12 }
 0x37b   : > { %1788 = dma.done.wait (!%p1573_p0), %s1341_s29, 1024  }
 0x37c   : > { %1790 = vsyncadd (!%p1573_p0), %s1341_s29, 4294966272  ;;  %s23_s26 = sadd.s32 1, %s1813_s26   ;;  %s2358_s21 = smov %s1797_s22 }
 0x37d   : > { %p20_p5 = scmp.ge.s32.totalorder %s23_s26, 4   ;;  %s2359_s22 = smov %s1801_s23 }
 0x37e   : > { %s2360_s23 = smov %s1975_s20  ;;  %s2361_s24 = smov %s1809_s25 }
 0x37f   : > { %s2362_s25 = smov %s2364_s13  ;;  %22 = sbr.rel (!%p20_p5) target bundleno = 7 (0x7), region = 99 }
 0x386   :  { %1346 = vsyncpa [#allocation4], 1 }
 0x387   :  { %1348 = vsyncpa [#allocation4 + $0x1], 1 }
 0x388   :  { %1349 = vsyncpa [#allocation7], 1 }
 0x389   :  { %1350 = vsyncpa [#allocation5], 1 }
 0x38a   :  { %1352 = vsyncpa [#allocation5 + $0x1], 1 }

</bundles_post_ra>
